<compile_context>
chip_gen: v6e
topology: v6e:2x2x1
jax: 0.10.0
libtpu: 0.0.40
codegen_flags: <defaults>
</compile_context>

<pallas_src>
import numpy as np
import jax
import jax.numpy as jnp
from jax.experimental import pallas as pl
from jax.experimental.pallas import tpu as pltpu

INT_PO_TYPE = 5
INT_NE_TYPE = 6

_LANES = 128


# ------------------------- Pallas kernel -------------------------

def _symple_embed_kernel(lhs_ref, rep_ref, argmat_ref, table_ref, out_ref):
    """One grid step: (rows, 4P) packed node scalars -> (rows, 128) embeddings.

    lhs_ref    : (rows, 4P)    bf16  [type + slot*D | arg_hi | arg_mid | arg_lo]
    rep_ref    : (4P, 128)     bf16  broadcasts column group 0 over each slot's D lanes
    argmat_ref : (4P, 128)     bf16  scatters column groups 1..3 onto each slot's last lane
    table_ref  : (3, 128, 128) bf16  hi/mid/lo planes of kron(I_P, table_padded)
    out_ref    : (rows, 128)   f32   lane-dense packed embeddings
    """
    lhs = lhs_ref[...]

    # Broadcast (type + slot*D) across the slot's D lanes with a tiny matmul
    # (MXU is otherwise idle; avoids any sublane<->lane relayout).  Values are
    # small integers (< 128) so this is exact in bf16.
    tshift = jnp.dot(lhs, rep_ref[...], preferred_element_type=jnp.float32)

    # Lane l belongs to slot l // D and is the one-hot lane iff type + slot*D == l.
    # Exact float compare of small integers.
    lane = jax.lax.broadcasted_iota(jnp.int32, tshift.shape, 1).astype(jnp.float32)
    onehot = (tshift == lane).astype(jnp.bfloat16)

    # Gather = one-hot matmul against the block-diagonal table; one native bf16
    # MXU pass per plane, hi + mid + lo reconstructs the f32 table to ~1e-7.
    emb = jnp.dot(onehot, table_ref[0], preferred_element_type=jnp.float32)
    emb = emb + jnp.dot(onehot, table_ref[1], preferred_element_type=jnp.float32)
    emb = emb + jnp.dot(onehot, table_ref[2], preferred_element_type=jnp.float32)

    # emb[-1] = arg for integer-typed nodes: the arg lane of those table rows
    # was zeroed host-side, so a single scatter-matmul add finishes the job.
    argc = jnp.dot(lhs, argmat_ref[...], preferred_element_type=jnp.float32)

    out_ref[...] = emb + argc
    # TODO(synk): optional bf16 out_ref would halve store traffic of this
    # store-bound kernel, at the cost of deviating from f32 torch semantics.


# ------------------------- wrapper -------------------------

def _split_bf16_planes(x):
    """Split an f32 array into 3 bf16 planes whose sum reconstructs x to ~1e-7."""
    p0 = x.astype(jnp.bfloat16)
    r1 = x - p0.astype(jnp.float32)
    p1 = r1.astype(jnp.bfloat16)
    r2 = r1 - p1.astype(jnp.float32)
    p2 = r2.astype(jnp.bfloat16)
    return p0, p1, p2


def make_symple_embedder(table, *, block_rows=8192,
                         int_po_type=INT_PO_TYPE, int_ne_type=INT_NE_TYPE):
    """Builds a jitted embed(types, args) -> [n_pad, D] f32 function.

    table: [V, D] f32 embedding table with D | 128 and V <= D.
    The returned function embeds a flattened batch of nodes; its output is
    row-padded to the packing granularity — trim to N on the host (trimming
    on device would round-trip the whole result through HBM again).
    block_rows: packed 128-lane rows per grid step (sweep ~2048..16384).
    """
    table = jnp.asarray(table, jnp.float32)
    V, D = table.shape
    if _LANES % D != 0 or D < 4:
        raise ValueError("embedding_dim must divide 128 and be >= 4")
    P = _LANES // D
    if V > D:
        # TODO(synk): support V > D with a wider one-hot slot if ever needed.
        raise ValueError("packed one-hot gather needs num_embeddings <= embedding_dim")
    # Exact bf16 encoding / float equality relies on type ids and packed lane
    # indices being small integers (< 128).
    assert 0 <= max(int_po_type, int_ne_type) < _LANES

    block_rows = max(16, (int(block_rows) // 16) * 16)

    # ---- table-derived constants (built once, closed over by the jit) ----
    tpad = np.zeros((D, D), np.float32)
    tpad[:V] = np.asarray(table, np.float32)
    for t in (int_po_type, int_ne_type):
        if t < V:
            tpad[t, D - 1] = 0.0                   # arg is added back by the kernel
    texp = jnp.asarray(np.kron(np.eye(P, dtype=np.float32), tpad))        # (128, 128)
    table_planes = jnp.stack(_split_bf16_planes(texp))                    # (3, 128, 128) bf16

    rep = np.kron(np.eye(P, dtype=np.float32), np.ones((1, D), np.float32))          # (P, 128)
    scat = np.kron(np.eye(P, dtype=np.float32), np.eye(D, dtype=np.float32)[-1:])    # (P, 128)
    rhs_rep = np.zeros((4 * P, _LANES), np.float32)
    rhs_rep[:P] = rep
    rhs_arg = np.zeros((4 * P, _LANES), np.float32)
    rhs_arg[P:2 * P] = scat
    rhs_arg[2 * P:3 * P] = scat
    rhs_arg[3 * P:] = scat
    rhs_rep = jnp.asarray(rhs_rep, jnp.bfloat16)        # exact 0/1 values
    rhs_arg = jnp.asarray(rhs_arg, jnp.bfloat16)

    def _embed(types, args):
        n = int(types.shape[0])
        pad = (-n) % (P * 16)                  # row granularity: 16 sublanes of P nodes
        npad = n + pad
        if pad:
            types = jnp.pad(types, (0, pad))   # padded slots embed type 0; trimmed on host
            args = jnp.pad(args, (0, pad))
        rows_total = npad // P

        types = types.astype(jnp.int32)
        args = args.astype(jnp.float32)
        is_int = (types == int_po_type) | (types == int_ne_type)

        # per-slot shifted type so the kernel compares against a plain lane iota
        tsh = (types + (jnp.arange(npad, dtype=jnp.int32) % P) * D).astype(jnp.bfloat16)
        a_hi, a_mid, a_lo = _split_bf16_planes(jnp.where(is_int, args, 0.0))
        lhs = jnp.concatenate(
            [tsh.reshape(rows_total, P),
             a_hi.reshape(rows_total, P),
             a_mid.reshape(rows_total, P),
             a_lo.reshape(rows_total, P)], axis=1)                 # (rows_total, 4P) bf16

        # Block size: large enough to amortize the ~0.35us per-grid-step
        # overhead, small enough to keep >= 4 grid steps when there is data
        # for it (v7x's two TensorCores share the "parallel" axis).
        br = max(64, ((pl.cdiv(rows_total, 4) + 15) // 16) * 16)
        br = min(block_rows, br, rows_total)
        grid = (pl.cdiv(rows_total, br),)

        out_pk = pl.pallas_call(
            _symple_embed_kernel,
            out_shape=jax.ShapeDtypeStruct((rows_total, _LANES), jnp.float32),
            grid_spec=pltpu.PrefetchScalarGridSpec(
                num_scalar_prefetch=0,
                grid=grid,
                in_specs=[
                    pl.BlockSpec((br, 4 * P), lambda i: (i, 0)),              # packed node scalars
                    pl.BlockSpec((4 * P, _LANES), lambda i: (0, 0)),          # rep matrix (resident)
                    pl.BlockSpec((4 * P, _LANES), lambda i: (0, 0)),          # arg scatter (resident)
                    pl.BlockSpec((3, _LANES, _LANES), lambda i: (0, 0, 0)),   # table planes (resident)
                ],
                out_specs=pl.BlockSpec((br, _LANES), lambda i: (i, 0)),
            ),
            compiler_params=pltpu.CompilerParams(
                dimension_semantics=("parallel",),   # shard store-bound grid over v7x's 2 TCs
                vmem_limit_bytes=32 * 1024 * 1024,   # fits v5e/v6e/v7x with 2x buffered 4 MiB blocks
            ),
        )(lhs, rhs_rep, rhs_arg, table_planes)

        # Packed [rows_total, 128] row-major is exactly [npad, D] row-major, so
        # this reshape is free.  Deliberately NO [:n] here — a device-side trim
        # would re-copy the whole output through HBM; trim on the host instead.
        return out_pk.reshape(npad, D)

    return jax.jit(_embed)


# ------------------------- host-side tree glue -------------------------

class ExprNode:
    def __init__(self, type_, arg=0.0, a=None, b=None):
        self.type = type_
        self.arg = arg
        self.a = a
        self.b = b
        self.embedding = None


def _flatten(node, nodes):
    if node is None:
        return
    nodes.append(node)
    _flatten(node.a, nodes)
    _flatten(node.b, nodes)


def symple_embedding_forward(root, embed_fn):
    """Mirrors SympleEmbedding.forward: annotates every node with a (1, D)
    embedding and returns the root."""
    nodes = []
    _flatten(root, nodes)
    types = jnp.asarray(np.array([nd.type for nd in nodes], np.int32))
    args = jnp.asarray(np.array([float(nd.arg) for nd in nodes], np.float32))
    out = np.asarray(jax.block_until_ready(embed_fn(types, args)))   # padded; trim per node
    for i, nd in enumerate(nodes):
        nd.embedding = out[i:i + 1]              # shape (1, D), like [None, :]
    return root


# ------------------------- reference + demo -------------------------

def _reference(types, args, table):
    emb = jnp.take(jnp.asarray(table, jnp.float32), types, axis=0)     # (N, D)
    mask = (types == INT_PO_TYPE) | (types == INT_NE_TYPE)             # (N,)
    last = jnp.where(mask, args, emb[:, -1])
    return emb.at[:, -1].set(last)


if __name__ == "__main__":
    key = jax.random.PRNGKey(0)
    V, D = 16, 32            # nn.Embedding(num_embeddings=16, embedding_dim=32)
    k_tab, k_typ, k_arg = jax.random.split(key, 3)
    table = jax.random.normal(k_tab, (V, D), dtype=jnp.float32)

    embed = make_symple_embedder(table)

    # ---- flattened-batch check (exercises padding + a multi-step grid) ----
    Nb = 2000
    b_types = jax.random.randint(k_typ, (Nb,), 0, V, dtype=jnp.int32)
    b_args = jax.random.normal(k_arg, (Nb,), dtype=jnp.float32)
    got = np.asarray(jax.block_until_ready(embed(b_types, b_args)))[:Nb]
    ref = np.asarray(_reference(b_types, b_args, table))
    np.testing.assert_allclose(got, ref, rtol=1e-6, atol=1e-6)

    # ---- expression-tree forward: (3 + (-2)) * x ----
    root = ExprNode(
        type_=1,
        a=ExprNode(type_=2,
                   a=ExprNode(INT_PO_TYPE, arg=3.0),
                   b=ExprNode(INT_NE_TYPE, arg=-2.0)),
        b=ExprNode(type_=7))
    root = symple_embedding_forward(root, embed)

    nodes = []
    _flatten(root, nodes)
    t_types = jnp.asarray([nd.type for nd in nodes], dtype=jnp.int32)
    t_args = jnp.asarray([nd.arg for nd in nodes], dtype=jnp.float32)
    t_ref = np.asarray(_reference(t_types, t_args, table))
    t_got = np.stack([nd.embedding[0] for nd in nodes], axis=0)

    assert all(nd.embedding.shape == (1, D) for nd in nodes)
    np.testing.assert_allclose(t_got, t_ref, rtol=1e-6, atol=1e-6)
    print("KERNEL_OK")
</pallas_src>

<mosaic_0001>
module attributes {stable_mosaic.version = 11 : i64} {
  func.func @_symple_embed_kernel(%arg0: i32, %arg1: memref<128x16xbf16, #tpu.memory_space<vmem>>, %arg2: memref<16x128xbf16, #tpu.memory_space<vmem>>, %arg3: memref<16x128xbf16, #tpu.memory_space<vmem>>, %arg4: memref<3x128x128xbf16, #tpu.memory_space<vmem>>, %arg5: memref<128x128xf32, #tpu.memory_space<vmem>>) attributes {dimension_semantics = [#tpu.dimension_semantics<parallel>], iteration_bounds = array<i64: 4>, scalar_prefetch = 0 : i64, scratch_operands = 0 : i64, tpu.core_type = #tpu.core_type<tc>, window_params = [{transform_indices = @transform_0, window_bounds = array<i64: 128, 16>}, {pipeline_mode = #tpu.pipeline_mode<synchronous>, transform_indices = @transform_1, window_bounds = array<i64: 16, 128>}, {pipeline_mode = #tpu.pipeline_mode<synchronous>, transform_indices = @transform_2, window_bounds = array<i64: 16, 128>}, {pipeline_mode = #tpu.pipeline_mode<synchronous>, transform_indices = @transform_3, window_bounds = array<i64: 3, 128, 128>}, {transform_indices = @transform_4, window_bounds = array<i64: 128, 128>}]} {
    %c0 = arith.constant 0 : index
    %c0_0 = arith.constant 0 : index
    %0 = vector.load %arg1[%c0, %c0_0] : memref<128x16xbf16, #tpu.memory_space<vmem>>, vector<128x16xbf16>
    %c0_1 = arith.constant 0 : index
    %c0_2 = arith.constant 0 : index
    %1 = vector.load %arg2[%c0_1, %c0_2] : memref<16x128xbf16, #tpu.memory_space<vmem>>, vector<16x128xbf16>
    %cst = arith.constant dense<0.000000e+00> : vector<128x128xf32>
    %2 = tpu.matmul %0, %1, %cst {dimension_numbers = #tpu.dot_dimension_numbers<[1], [0], [0], [1], [0, 0, 1, 1], [], []>} : vector<128x16xbf16>, vector<16x128xbf16>, vector<128x128xf32> -> vector<128x128xf32>
    %3 = tpu.iota {dimensions = array<i32: 1>} : vector<128x128xi32>
    %4 = arith.sitofp %3 : vector<128x128xi32> to vector<128x128xf32>
    %5 = arith.cmpf oeq, %2, %4 : vector<128x128xf32>
    %6 = arith.extui %5 : vector<128x128xi1> to vector<128x128xi32>
    %7 = arith.sitofp %6 : vector<128x128xi32> to vector<128x128xf32>
    %8 = arith.truncf %7 : vector<128x128xf32> to vector<128x128xbf16>
    %c0_3 = arith.constant 0 : index
    %c0_4 = arith.constant 0 : index
    %c0_5 = arith.constant 0 : index
    %9 = vector.load %arg4[%c0_3, %c0_4, %c0_5] : memref<3x128x128xbf16, #tpu.memory_space<vmem>>, vector<1x128x128xbf16>
    %10 = vector.shape_cast %9 : vector<1x128x128xbf16> to vector<128x128xbf16>
    %cst_6 = arith.constant dense<0.000000e+00> : vector<128x128xf32>
    %11 = tpu.matmul %8, %10, %cst_6 {dimension_numbers = #tpu.dot_dimension_numbers<[1], [0], [0], [1], [0, 0, 1, 1], [], []>} : vector<128x128xbf16>, vector<128x128xbf16>, vector<128x128xf32> -> vector<128x128xf32>
    %c1 = arith.constant 1 : index
    %c0_7 = arith.constant 0 : index
    %c0_8 = arith.constant 0 : index
    %12 = vector.load %arg4[%c1, %c0_7, %c0_8] : memref<3x128x128xbf16, #tpu.memory_space<vmem>>, vector<1x128x128xbf16>
    %13 = vector.shape_cast %12 : vector<1x128x128xbf16> to vector<128x128xbf16>
    %cst_9 = arith.constant dense<0.000000e+00> : vector<128x128xf32>
    %14 = tpu.matmul %8, %13, %cst_9 {dimension_numbers = #tpu.dot_dimension_numbers<[1], [0], [0], [1], [0, 0, 1, 1], [], []>} : vector<128x128xbf16>, vector<128x128xbf16>, vector<128x128xf32> -> vector<128x128xf32>
    %15 = arith.addf %11, %14 : vector<128x128xf32>
    %c2 = arith.constant 2 : index
    %c0_10 = arith.constant 0 : index
    %c0_11 = arith.constant 0 : index
    %16 = vector.load %arg4[%c2, %c0_10, %c0_11] : memref<3x128x128xbf16, #tpu.memory_space<vmem>>, vector<1x128x128xbf16>
    %17 = vector.shape_cast %16 : vector<1x128x128xbf16> to vector<128x128xbf16>
    %cst_12 = arith.constant dense<0.000000e+00> : vector<128x128xf32>
    %18 = tpu.matmul %8, %17, %cst_12 {dimension_numbers = #tpu.dot_dimension_numbers<[1], [0], [0], [1], [0, 0, 1, 1], [], []>} : vector<128x128xbf16>, vector<128x128xbf16>, vector<128x128xf32> -> vector<128x128xf32>
    %19 = arith.addf %15, %18 : vector<128x128xf32>
    %c0_13 = arith.constant 0 : index
    %c0_14 = arith.constant 0 : index
    %20 = vector.load %arg3[%c0_13, %c0_14] : memref<16x128xbf16, #tpu.memory_space<vmem>>, vector<16x128xbf16>
    %cst_15 = arith.constant dense<0.000000e+00> : vector<128x128xf32>
    %21 = tpu.matmul %0, %20, %cst_15 {dimension_numbers = #tpu.dot_dimension_numbers<[1], [0], [0], [1], [0, 0, 1, 1], [], []>} : vector<128x16xbf16>, vector<16x128xbf16>, vector<128x128xf32> -> vector<128x128xf32>
    %22 = arith.addf %19, %21 : vector<128x128xf32>
    %c0_16 = arith.constant 0 : index
    %c0_17 = arith.constant 0 : index
    %23 = vector.load %arg5[%c0_16, %c0_17] : memref<128x128xf32, #tpu.memory_space<vmem>>, vector<128x128xf32>
    tpu.vector_store %arg5[%c0_16, %c0_17], %22 {strides = array<i32>} : memref<128x128xf32, #tpu.memory_space<vmem>>, vector<128x128xf32>,
    return
  }
  func.func @transform_0(%arg0: i32) -> (i32, i32) {
    %c0_i32 = arith.constant 0 : i32
    %c0_i32_0 = arith.constant 0 : i32
    return %arg0, %c0_i32 : i32, i32
  }
  func.func @transform_1(%arg0: i32) -> (i32, i32) {
    %c0_i32 = arith.constant 0 : i32
    %c0_i32_0 = arith.constant 0 : i32
    %c0_i32_1 = arith.constant 0 : i32
    return %c0_i32, %c0_i32_0 : i32, i32
  }
  func.func @transform_2(%arg0: i32) -> (i32, i32) {
    %c0_i32 = arith.constant 0 : i32
    %c0_i32_0 = arith.constant 0 : i32
    %c0_i32_1 = arith.constant 0 : i32
    return %c0_i32, %c0_i32_0 : i32, i32
  }
  func.func @transform_3(%arg0: i32) -> (i32, i32, i32) {
    %c0_i32 = arith.constant 0 : i32
    %c0_i32_0 = arith.constant 0 : i32
    %c0_i32_1 = arith.constant 0 : i32
    %c0_i32_2 = arith.constant 0 : i32
    return %c0_i32, %c0_i32_0, %c0_i32_1 : i32, i32, i32
  }
  func.func @transform_4(%arg0: i32) -> (i32, i32) {
    %c0_i32 = arith.constant 0 : i32
    %c0_i32_0 = arith.constant 0 : i32
    return %arg0, %c0_i32 : i32, i32
  }
}

</mosaic_0001>

<bundles_post_ra>
// kernel: _embed.1
= control target key start
LH: loop header
LB: loop body
LE: loop exit
PB: predicated region body
PF: predicated region fallthrough
CT: control target
= control target key end

     0   :  { %s1573_s15 = smov 0   ;;  %s1912_s0 = inlined_call_operand.vmem [shape: bf16[512,16], index: 0, kind: input, shape index: {}]   ;;  %s1913_s1 = inlined_call_operand.vmem [shape: bf16[16,128], index: 1, kind: input, shape index: {}]   ;;  %s1914_s2 = inlined_call_operand.vmem [shape: bf16[16,128], index: 2, kind: input, shape index: {}]   ;;  %s1915_s3 = inlined_call_operand.vmem [shape: bf16[3,128,128], index: 3, kind: input, shape index: {}]   ;;  %s1916_s4 = inlined_call_operand.vmem [shape: f32[512,128], index: 4, kind: output, shape index: {}]  }
   0x1 LB: > { %s1141_s16 = sadd.s32 4294967295, %s1545_s15   ;;  %p1145_p0 = scmp.ge.s32.totalorder %s1545_s15, 1  ;;  %s1545_s15 = sphi %s1573_s15, %s14_s15  }
   0x2   : > { %p163_p1 = scmp.lt.s32.totalorder %s1545_s15, 5 }
   0x4   : > { %p164_p2 = pnand %p1145_p0, %p163_p1 }
   0x5   : > { %s1146_s19 = sshll.u32 (!%p164_p2), %s1141_s16, 4 }
   0x6   : > { %167 = sbr.rel (%p164_p2) target bundleno = 478 (0x1de), region = 36  ;;  %p190_p3 = scmp.lt.s32.totalorder (!%p164_p2), %s1146_s19, 63 }
   0xb   : > { %v1505_v0 = vld [vmem:[%s1913_s1] sm:$0xff]   ;;  %v1514_v1 = vld [vmem:[%s1915_s3 + $0x78] sm:$0xff]   ;;  %s1934_s19 = smov (!%p190_p3, %s1146_s19), 63  ;;  %v1516_v3 = vld [vmem:[%s1915_s3 + $0x70] sm:$0xff]   ;;  %vm266_vm0 = vcmask 130048   ;;  %v388_v27 = vlaneseq }
   0xc   : > { %1364 = vmatprep.subr.bf16.mxu0 %v1505_v0  ;;  %v1515_v2 = vld [vmem:[%s1915_s3 + $0x38] sm:$0xff]   ;;  %1382 = vmatprep.subr.bf16.mxu1 %v1514_v1  ;;  %s1147_s26 = sshll.u32 %s1934_s19, 2  ;;  %v1517_v4 = vld [vmem:[%s1915_s3 + $0x30] sm:$0xff]   ;;  %v1518_v5 = vld [vmem:[%s1915_s3 + $0x68] sm:$0xff]   ;;  %v1547_v38 = vmov 1.0|1.0  }
   0xd   : > { %1365 = vmatpush3.bf16.msra.mxu0 %v1505_v0  ;;  %1383 = vmatpush3.bf16.msra.mxu1 %v1514_v1  ;;  %s1599_s29 = scalar_lea.vmem %s1912_s0, %s1147_s26  ;;  %v1519_v11 = vld [vmem:[%s1915_s3 + $0x28] sm:$0xff]   ;;  %v1520_v12 = vld [vmem:[%s1915_s3 + $0x60] sm:$0xff]   ;;  %v1522_v14 = vld [vmem:[%s1915_s3 + $0x58] sm:$0xff]   ;;  %v389_v29 = vand.u32 127, %v388_v27  ;;  %s1149_s26 = sshll.u32 %s1934_s19, 3 }
   0xe   : > { %1414 = vmatprep.subr.bf16.mxu0 %v1515_v2  ;;  %1384 = vmatprep.subr.bf16.mxu1 %v1516_v3  ;;  %v1608_v6 = vld [vmem:[%s1599_s29] sm:$0xff]   ;;  %v1611_v7 = vld [vmem:[%s1599_s29 + $0x8] sm:$0xff]   ;;  %v1616_v8 = vld [vmem:[%s1599_s29 + $0x10] sm:$0xff]   ;;  %s1877_s30 = scalar_lea.vmem %s1916_s4, %s1149_s26 }
   0xf   : > { %1366 = vmatprep.mubr.msk.bf16.mxu0 %vm266_vm0, %v1608_v6  ;;  %v1623_v9 = vld [vmem:[%s1599_s29 + $0x18] sm:$0xff]   ;;  %v1626_v10 = vld [vmem:[%s1599_s29 + $0x20] sm:$0xff]   ;;  %v1645_v15 = vld [vmem:[%s1599_s29 + $0x28] sm:$0xff]   ;;  %v1686_v31 = vcvt.s32.f32 %v389_v29 }
  0x10   : > { %1367 = vmatmul.mubr.msk.bf16.vlgmr.msra.gmra.mxu0 %vm266_vm0, %v1611_v7  ;;  %v1521_v13 = vld [vmem:[%s1915_s3 + $0x20] sm:$0xff]   ;;  %v1523_v16 = vld [vmem:[%s1915_s3 + $0x18] sm:$0xff]   ;;  %v1651_v17 = vld [vmem:[%s1599_s29 + $0x30] sm:$0xff]  }
  0x11   : > { %1385 = vmatpush3.bf16.msra.mxu1 %v1516_v3  ;;  %1370 = vmatprep.mubr.msk.bf16.mxu0 %vm266_vm0, %v1616_v8  ;;  %v1524_v18 = vld [vmem:[%s1915_s3 + $0x50] sm:$0xff]   ;;  %v1664_v20 = vld [vmem:[%s1599_s29 + $0x38] sm:$0xff]   ;;  %v1526_v21 = vld [vmem:[%s1915_s3 + $0x48] sm:$0xff]  }
  0x12   : > { %1386 = vmatprep.subr.bf16.mxu1 %v1518_v5  ;;  %1415 = vmatpush3.bf16.msra.mxu0 %v1515_v2  ;;  %v1525_v19 = vld [vmem:[%s1915_s3 + $0x10] sm:$0xff]   ;;  %v1527_v22 = vld [vmem:[%s1915_s3 + $0x8] sm:$0xff]   ;;  %v1528_v23 = vld [vmem:[%s1915_s3 + $0x40] sm:$0xff]  }
  0x13   : > { %1416 = vmatprep.subr.bf16.mxu0 %v1517_v4  ;;  %v1529_v24 = vld [vmem:[%s1915_s3] sm:$0xff]   ;;  %v1530_v25 = vld [vmem:[%s1915_s3 + $0xb8] sm:$0xff]   ;;  %v1532_v36 = vld [vmem:[%s1915_s3 + $0xb0] sm:$0xff]  }
  0x14   : > { %v1531_v26 = vld [vmem:[%s1914_s2] sm:$0xff]   ;;  %v1533_v41 = vld [vmem:[%s1915_s3 + $0xa8] sm:$0xff]   ;;  %v1535_v49 = vld [vmem:[%s1915_s3 + $0x98] sm:$0xff]  }
  0x15   : > { %1387 = vmatpush3.bf16.msra.mxu1 %v1518_v5  ;;  %v1534_v45 = vld [vmem:[%s1915_s3 + $0xa0] sm:$0xff]   ;;  %v1536_v53 = vld [vmem:[%s1915_s3 + $0x90] sm:$0xff]   ;;  %v1537_v57 = vld [vmem:[%s1915_s3 + $0x88] sm:$0xff]  }
  0x16   : > { %1417 = vmatpush3.bf16.msra.mxu0 %v1517_v4  ;;  %1388 = vmatprep.subr.bf16.mxu1 %v1520_v12  ;;  %v1538_v60 = vld [vmem:[%s1915_s3 + $0x80] sm:$0xff]  }
  0x17   : > { %1418 = vmatprep.subr.bf16.mxu0 %v1519_v11 }
  0x18   : > { %1371 = vmatmul.mubr.msk.bf16.gmra.mxu0 %vm266_vm0, %v1623_v9 }
  0x19   : > { %1374 = vmatprep.mubr.msk.bf16.mxu0 %vm266_vm0, %v1626_v10  ;;  %1389 = vmatpush3.bf16.msra.mxu1 %v1520_v12 }
  0x1a   : > { %1419 = vmatpush3.bf16.msra.mxu0 %v1519_v11  ;;  %1390 = vmatprep.subr.bf16.mxu1 %v1522_v14 }
  0x1b   : > { %1420 = vmatprep.subr.bf16.mxu0 %v1521_v13 }
  0x1d   : > { %1391 = vmatpush3.bf16.msra.mxu1 %v1522_v14 }
  0x1e   : > { %1421 = vmatpush3.bf16.msra.mxu0 %v1521_v13  ;;  %1392 = vmatprep.subr.bf16.mxu1 %v1524_v18 }
  0x1f   : > { %1422 = vmatprep.subr.bf16.mxu0 %v1523_v16 }
  0x20   : > { %1375 = vmatmul.mubr.msk.bf16.gmra.mxu0 %vm266_vm0, %v1645_v15 }
  0x21   : > { %1378 = vmatprep.mubr.msk.bf16.mxu0 %vm266_vm0, %v1651_v17  ;;  %1393 = vmatpush3.bf16.msra.mxu1 %v1524_v18 }
  0x22   : > { %1423 = vmatpush3.bf16.msra.mxu0 %v1523_v16  ;;  %1394 = vmatprep.subr.bf16.mxu1 %v1526_v21 }
  0x23   : > { %1424 = vmatprep.subr.bf16.mxu0 %v1525_v19 }
  0x25   : > { %1395 = vmatpush3.bf16.msra.mxu1 %v1526_v21 }
  0x26   : > { %1425 = vmatpush3.bf16.msra.mxu0 %v1525_v19  ;;  %1396 = vmatprep.subr.bf16.mxu1 %v1528_v23 }
  0x27   : > { %1426 = vmatprep.subr.bf16.mxu0 %v1527_v22 }
  0x28   : > { %1379 = vmatmul.mubr.msk.bf16.gmra.mxu0 %vm266_vm0, %v1664_v20 }
  0x29   : > { %1397 = vmatpush3.bf16.msra.mxu1 %v1528_v23 }
  0x2a   : > { %1427 = vmatpush3.bf16.msra.mxu0 %v1527_v22  ;;  %1446 = vmatprep.subr.bf16.mxu1 %v1530_v25 }
  0x2b   : > { %1428 = vmatprep.subr.bf16.mxu0 %v1529_v24 }
  0x2e   : > { %1429 = vmatpush3.bf16.msra.mxu0 %v1529_v24 }
  0x2f   : > { %1478 = vmatprep.subr.bf16.mxu0 %v1531_v26 }
  0xd0   : > { %v1368_v28 = vpop.f32.mrf.mxu0 }
  0xd1   : > { %vm393_vm4 = vcmp.eq.f32.partialorder %v1368_v28, %v1686_v31 }
  0xd2   : > { %v325_v30 = vpop.f32.mrf.mxu0 }
  0xd3   : > { %vm391_vm2 = vcmp.eq.f32.partialorder %v325_v30, %v1686_v31 }
  0xd4   : > { %v1369_v32 = vpop.f32.mrf.mxu0 }
  0xd5   : > { %vm394_vm1 = vcmp.eq.f32.partialorder %v1369_v32, %v1686_v31 }
  0xd6   : > { %v328_v33 = vpop.f32.mrf.mxu0  ;;  %vm1699_vm6 = vmpackc.low %vm394_vm1, %vm393_vm4 }
  0xd7   : > { %vm392_vm3 = vcmp.eq.f32.partialorder %v328_v33, %v1686_v31 }
  0xd8   : > { %vm1692_vm5 = vmpackc.low %vm392_vm3, %vm391_vm2  ;;  %v1372_v35 = vpop.f32.mrf.mxu0 }
  0xd9   : > { %1398 = vmatprep.mubr.msk.bf16.mxu1 %vm1692_vm5, %v1547_v38  ;;  %1430 = vmatprep.mubr.msk.bf16.mxu0 %vm1692_vm5, %v1547_v38  ;;  %vm397_vm10 = vcmp.eq.f32.partialorder %v1372_v35, %v1686_v31 }
  0xda   : > { %v341_v39 = vpop.f32.mrf.mxu0  ;;  %1399 = vmatmul.mubr.msk.bf16.vlgmr.msra.gmra.mxu1 %vm1699_vm6, %v1547_v38  ;;  %1431 = vmatmul.mubr.msk.bf16.vlgmr.msra.gmra.mxu0 %vm1699_vm6, %v1547_v38 }
  0xdb   : > { %1447 = vmatpush3.bf16.msra.mxu1 %v1530_v25  ;;  %1479 = vmatpush3.bf16.msra.mxu0 %v1531_v26  ;;  %vm395_vm8 = vcmp.eq.f32.partialorder %v341_v39, %v1686_v31 }
  0xdc   : > { %v1373_v40 = vpop.f32.mrf.mxu0  ;;  %1448 = vmatprep.subr.bf16.mxu1 %v1532_v36 }
  0xdd   : > { %vm398_vm7 = vcmp.eq.f32.partialorder %v1373_v40, %v1686_v31 }
  0xde   : > { %v344_v42 = vpop.f32.mrf.mxu0  ;;  %vm1729_vm12 = vmpackc.low %vm398_vm7, %vm397_vm10 }
  0xdf   : > { %vm396_vm9 = vcmp.eq.f32.partialorder %v344_v42, %v1686_v31  ;;  %1449 = vmatpush3.bf16.msra.mxu1 %v1532_v36 }
  0xe0   : > { %vm1722_vm11 = vmpackc.low %vm396_vm9, %vm395_vm8  ;;  %v1376_v44 = vpop.f32.mrf.mxu0  ;;  %1450 = vmatprep.subr.bf16.mxu1 %v1533_v41 }
  0xe1   : > { %1402 = vmatprep.mubr.msk.bf16.mxu1 %vm1722_vm11, %v1547_v38  ;;  %1434 = vmatprep.mubr.msk.bf16.mxu0 %vm1722_vm11, %v1547_v38  ;;  %vm401_vm1 = vcmp.eq.f32.partialorder %v1376_v44, %v1686_v31 }
  0xe2   : > { %v357_v47 = vpop.f32.mrf.mxu0  ;;  %1403 = vmatmul.mubr.msk.bf16.gmra.mxu1 %vm1729_vm12, %v1547_v38  ;;  %1435 = vmatmul.mubr.msk.bf16.gmra.mxu0 %vm1729_vm12, %v1547_v38 }
  0xe3   : > { %1451 = vmatpush3.bf16.msra.mxu1 %v1533_v41  ;;  %vm399_vm14 = vcmp.eq.f32.partialorder %v357_v47, %v1686_v31 }
  0xe4   : > { %v1377_v48 = vpop.f32.mrf.mxu0  ;;  %1452 = vmatprep.subr.bf16.mxu1 %v1534_v45 }
  0xe5   : > { %vm402_vm13 = vcmp.eq.f32.partialorder %v1377_v48, %v1686_v31 }
  0xe6   : > { %v360_v50 = vpop.f32.mrf.mxu0  ;;  %vm1759_vm3 = vmpackc.low %vm402_vm13, %vm401_vm1 }
  0xe7   : > { %vm400_vm15 = vcmp.eq.f32.partialorder %v360_v50, %v1686_v31  ;;  %1453 = vmatpush3.bf16.msra.mxu1 %v1534_v45 }
  0xe8   : > { %vm1752_vm2 = vmpackc.low %vm400_vm15, %vm399_vm14  ;;  %v1380_v52 = vpop.f32.mrf.mxu0  ;;  %1454 = vmatprep.subr.bf16.mxu1 %v1535_v49 }
  0xe9   : > { %1406 = vmatprep.mubr.msk.bf16.mxu1 %vm1752_vm2, %v1547_v38  ;;  %1438 = vmatprep.mubr.msk.bf16.mxu0 %vm1752_vm2, %v1547_v38  ;;  %vm405_vm9 = vcmp.eq.f32.partialorder %v1380_v52, %v1686_v31 }
  0xea   : > { %v373_v55 = vpop.f32.mrf.mxu0  ;;  %1407 = vmatmul.mubr.msk.bf16.gmra.mxu1 %vm1759_vm3, %v1547_v38  ;;  %1439 = vmatmul.mubr.msk.bf16.gmra.mxu0 %vm1759_vm3, %v1547_v38 }
  0xeb   : > { %1455 = vmatpush3.bf16.msra.mxu1 %v1535_v49  ;;  %vm403_vm7 = vcmp.eq.f32.partialorder %v373_v55, %v1686_v31 }
  0xec   : > { %v1381_v56 = vpop.f32.mrf.mxu0  ;;  %1456 = vmatprep.subr.bf16.mxu1 %v1536_v53 }
  0xed   : > { %vm406_vm4 = vcmp.eq.f32.partialorder %v1381_v56, %v1686_v31 }
  0xee   : > { %v376_v58 = vpop.f32.mrf.mxu0  ;;  %vm1789_vm13 = vmpackc.low %vm406_vm4, %vm405_vm9 }
  0xef   : > { %vm404_vm8 = vcmp.eq.f32.partialorder %v376_v58, %v1686_v31  ;;  %1457 = vmatpush3.bf16.msra.mxu1 %v1536_v53 }
  0xf0   : > { %vm1782_vm10 = vmpackc.low %vm404_vm8, %vm403_vm7  ;;  %1458 = vmatprep.subr.bf16.mxu1 %v1537_v57 }
  0xf1   : > { %1410 = vmatprep.mubr.msk.bf16.mxu1 %vm1782_vm10, %v1547_v38  ;;  %1442 = vmatprep.mubr.msk.bf16.mxu0 %vm1782_vm10, %v1547_v38 }
  0xf2   : > { %1411 = vmatmul.mubr.msk.bf16.gmra.mxu1 %vm1789_vm13, %v1547_v38  ;;  %1443 = vmatmul.mubr.msk.bf16.gmra.mxu0 %vm1789_vm13, %v1547_v38 }
  0xf3   : > { %1459 = vmatpush3.bf16.msra.mxu1 %v1537_v57  ;;  %1462 = vmatprep.mubr.msk.bf16.mxu1 %vm1692_vm5, %v1547_v38 }
  0xf4   : > { %1460 = vmatprep.subr.bf16.mxu1 %v1538_v60  ;;  %1480 = vmatprep.mubr.msk.bf16.mxu0 %vm266_vm0, %v1608_v6 }
  0xf7   : > { %1461 = vmatpush3.bf16.msra.mxu1 %v1538_v60 }
  0xfa   : > { %1463 = vmatmul.mubr.msk.bf16.vlgmr.msra.gmra.mxu1 %vm1699_vm6, %v1547_v38  ;;  %1481 = vmatmul.mubr.msk.bf16.vlgmr.msra.gmra.mxu0 %vm266_vm0, %v1611_v7 }
  0xfb   : > { %1466 = vmatprep.mubr.msk.bf16.mxu1 %vm1722_vm11, %v1547_v38  ;;  %1484 = vmatprep.mubr.msk.bf16.mxu0 %vm266_vm0, %v1616_v8 }
 0x102   : > { %1467 = vmatmul.mubr.msk.bf16.gmra.mxu1 %vm1729_vm12, %v1547_v38  ;;  %1485 = vmatmul.mubr.msk.bf16.gmra.mxu0 %vm266_vm0, %v1623_v9 }
 0x103   : > { %1470 = vmatprep.mubr.msk.bf16.mxu1 %vm1752_vm2, %v1547_v38  ;;  %1488 = vmatprep.mubr.msk.bf16.mxu0 %vm266_vm0, %v1626_v10 }
 0x10a   : > { %1471 = vmatmul.mubr.msk.bf16.gmra.mxu1 %vm1759_vm3, %v1547_v38  ;;  %1489 = vmatmul.mubr.msk.bf16.gmra.mxu0 %vm266_vm0, %v1645_v15 }
 0x10b   : > { %1474 = vmatprep.mubr.msk.bf16.mxu1 %vm1782_vm10, %v1547_v38  ;;  %1492 = vmatprep.mubr.msk.bf16.mxu0 %vm266_vm0, %v1651_v17 }
 0x112   : > { %1475 = vmatmul.mubr.msk.bf16.gmra.mxu1 %vm1789_vm13, %v1547_v38  ;;  %1493 = vmatmul.mubr.msk.bf16.gmra.mxu0 %vm266_vm0, %v1664_v20 }
 0x19a   : > { %v1400_v62 = vpop.f32.mrf.mxu1  ;;  %v1432_v63 = vpop.f32.mrf.mxu0 }
 0x19b   : > { %v716_v30 = vadd.f32 %v1432_v63, %v1400_v62 }
 0x19c   : > { %v562_v0 = vpop.f32.mrf.mxu1  ;;  %v707_v1 = vpop.f32.mrf.mxu0 }
 0x19d   : > { %v708_v33 = vadd.f32 %v707_v1, %v562_v0 }
 0x19e   : > { %v1401_v2 = vpop.f32.mrf.mxu1  ;;  %v1433_v3 = vpop.f32.mrf.mxu0 }
 0x19f   : > { %v719_v37 = vadd.f32 %v1433_v3, %v1401_v2 }
 0x1a0   : > { %v565_v4 = vpop.f32.mrf.mxu1  ;;  %v710_v5 = vpop.f32.mrf.mxu0 }
 0x1a1   : > { %v711_v42 = vadd.f32 %v710_v5, %v565_v4 }
 0x1a2   : > { %v1404_v6 = vpop.f32.mrf.mxu1  ;;  %v1436_v7 = vpop.f32.mrf.mxu0 }
 0x1a3   : > { %v732_v47 = vadd.f32 %v1436_v7, %v1404_v6 }
 0x1a4   : > { %v578_v8 = vpop.f32.mrf.mxu1  ;;  %v723_v9 = vpop.f32.mrf.mxu0 }
 0x1a5   : > { %v724_v52 = vadd.f32 %v723_v9, %v578_v8 }
 0x1a6   : > { %v1405_v10 = vpop.f32.mrf.mxu1  ;;  %v1437_v11 = vpop.f32.mrf.mxu0 }
 0x1a7   : > { %v735_v57 = vadd.f32 %v1437_v11, %v1405_v10 }
 0x1a8   : > { %v581_v12 = vpop.f32.mrf.mxu1  ;;  %v726_v13 = vpop.f32.mrf.mxu0 }
 0x1a9   : > { %v727_v62 = vadd.f32 %v726_v13, %v581_v12 }
 0x1aa   : > { %v1408_v14 = vpop.f32.mrf.mxu1  ;;  %v1440_v15 = vpop.f32.mrf.mxu0 }
 0x1ab   : > { %v748_v3 = vadd.f32 %v1440_v15, %v1408_v14 }
 0x1ac   : > { %v1845_v16 = vpop.f32.mrf.mxu1  ;;  %v1847_v17 = vpop.f32.mrf.mxu0 }
 0x1ad   : > { %v740_v8 = vadd.f32 %v1847_v17, %v1845_v16 }
 0x1ae   : > { %v1849_v18 = vpop.f32.mrf.mxu1  ;;  %v1851_v19 = vpop.f32.mrf.mxu0 }
 0x1af   : > { %v751_v13 = vadd.f32 %v1851_v19, %v1849_v18 }
 0x1b0   : > { %v1853_v20 = vpop.f32.mrf.mxu1  ;;  %v1855_v21 = vpop.f32.mrf.mxu0 }
 0x1b2   : > { %v1857_v22 = vpop.f32.mrf.mxu1  ;;  %v1859_v23 = vpop.f32.mrf.mxu0 }
 0x1b4   : > { %v1861_v24 = vpop.f32.mrf.mxu1  ;;  %v1863_v25 = vpop.f32.mrf.mxu0 }
 0x1b6   : > { %v1865_v26 = vpop.f32.mrf.mxu1  ;;  %v1867_v27 = vpop.f32.mrf.mxu0 }
 0x1b8   : > { %v1869_v28 = vpop.f32.mrf.mxu1  ;;  %v1871_v29 = vpop.f32.mrf.mxu0 }
 0x1ba   : > { %v1464_v31 = vpop.f32.mrf.mxu1  ;;  %v1482_v32 = vpop.f32.mrf.mxu0 }
 0x1bb   : > { %v934_v34 = vadd.f32 %v1464_v31, %v716_v30 }
 0x1bc   : > { %v869_v35 = vpop.f32.mrf.mxu1  ;;  %v990_v36 = vpop.f32.mrf.mxu0 }
 0x1bd   : > { %v1055_v38 = vadd.f32 %v1482_v32, %v934_v34  ;;  %v932_v39 = vadd.f32 %v869_v35, %v708_v33  ;;  %v743_v32 = vadd.f32 %v1855_v21, %v1853_v20  ;;  %v764_v35 = vadd.f32 %v1859_v23, %v1857_v22 }
 0x1be   : > { %v1465_v40 = vpop.f32.mrf.mxu1  ;;  %v1483_v41 = vpop.f32.mrf.mxu0 }
 0x1bf   : > { %1071 = vst [vmem:[%s1877_s30 + $0x10] sm:$0xff] %v1055_v38  ;;  %v1053_v43 = vadd.f32 %v990_v36, %v932_v39  ;;  %v935_v44 = vadd.f32 %v1465_v40, %v719_v37  ;;  %v756_v38 = vadd.f32 %v1863_v25, %v1861_v24 }
 0x1c0   : > { %v872_v45 = vpop.f32.mrf.mxu1  ;;  %v993_v46 = vpop.f32.mrf.mxu0 }
 0x1c1   : > { %1069 = vst [vmem:[%s1877_s30] sm:$0xff] %v1053_v43  ;;  %v1056_v48 = vadd.f32 %v1483_v41, %v935_v44  ;;  %v933_v49 = vadd.f32 %v872_v45, %v711_v42  ;;  %v767_v41 = vadd.f32 %v1867_v27, %v1865_v26  ;;  %v759_v44 = vadd.f32 %v1871_v29, %v1869_v28 }
 0x1c2   : > { %v1468_v50 = vpop.f32.mrf.mxu1  ;;  %v1486_v51 = vpop.f32.mrf.mxu0 }
 0x1c3   : > { %1072 = vst [vmem:[%s1877_s30 + $0x18] sm:$0xff] %v1056_v48  ;;  %v1054_v53 = vadd.f32 %v993_v46, %v933_v49  ;;  %v938_v54 = vadd.f32 %v1468_v50, %v732_v47 }
 0x1c4   : > { %v885_v55 = vpop.f32.mrf.mxu1  ;;  %v1006_v56 = vpop.f32.mrf.mxu0 }
 0x1c5   : > { %1070 = vst [vmem:[%s1877_s30 + $0x8] sm:$0xff] %v1054_v53  ;;  %v1059_v58 = vadd.f32 %v1486_v51, %v938_v54  ;;  %v936_v59 = vadd.f32 %v885_v55, %v724_v52 }
 0x1c6   : > { %v1469_v60 = vpop.f32.mrf.mxu1  ;;  %v1487_v61 = vpop.f32.mrf.mxu0 }
 0x1c7   : > { %1075 = vst [vmem:[%s1877_s30 + $0x30] sm:$0xff] %v1059_v58  ;;  %v1057_v63 = vadd.f32 %v1006_v56, %v936_v59  ;;  %v939_v0 = vadd.f32 %v1469_v60, %v735_v57 }
 0x1c8   : > { %v888_v1 = vpop.f32.mrf.mxu1  ;;  %v1009_v2 = vpop.f32.mrf.mxu0 }
 0x1c9   : > { %1073 = vst [vmem:[%s1877_s30 + $0x20] sm:$0xff] %v1057_v63  ;;  %v1060_v4 = vadd.f32 %v1487_v61, %v939_v0  ;;  %v937_v5 = vadd.f32 %v888_v1, %v727_v62 }
 0x1ca   : > { %v1472_v6 = vpop.f32.mrf.mxu1  ;;  %v1490_v7 = vpop.f32.mrf.mxu0 }
 0x1cb   : > { %1076 = vst [vmem:[%s1877_s30 + $0x38] sm:$0xff] %v1060_v4  ;;  %v1058_v9 = vadd.f32 %v1009_v2, %v937_v5  ;;  %v942_v10 = vadd.f32 %v1472_v6, %v748_v3 }
 0x1cc   : > { %v901_v11 = vpop.f32.mrf.mxu1  ;;  %v1022_v12 = vpop.f32.mrf.mxu0 }
 0x1cd   : > { %1074 = vst [vmem:[%s1877_s30 + $0x28] sm:$0xff] %v1058_v9  ;;  %v1063_v14 = vadd.f32 %v1490_v7, %v942_v10  ;;  %v940_v15 = vadd.f32 %v901_v11, %v740_v8 }
 0x1ce   : > { %v1473_v30 = vpop.f32.mrf.mxu1  ;;  %v1491_v31 = vpop.f32.mrf.mxu0 }
 0x1cf   : > { %1079 = vst [vmem:[%s1877_s30 + $0x50] sm:$0xff] %v1063_v14  ;;  %v1061_v16 = vadd.f32 %v1022_v12, %v940_v15  ;;  %v943_v17 = vadd.f32 %v1473_v30, %v751_v13 }
 0x1d0   : > { %v904_v33 = vpop.f32.mrf.mxu1  ;;  %v1025_v34 = vpop.f32.mrf.mxu0 }
 0x1d1   : > { %1077 = vst [vmem:[%s1877_s30 + $0x40] sm:$0xff] %v1061_v16  ;;  %v1064_v18 = vadd.f32 %v1491_v31, %v943_v17  ;;  %v941_v19 = vadd.f32 %v904_v33, %v743_v32 }
 0x1d2   : > { %v1476_v36 = vpop.f32.mrf.mxu1  ;;  %v1494_v37 = vpop.f32.mrf.mxu0 }
 0x1d3   : > { %1080 = vst [vmem:[%s1877_s30 + $0x58] sm:$0xff] %v1064_v18  ;;  %v1062_v20 = vadd.f32 %v1025_v34, %v941_v19  ;;  %v946_v21 = vadd.f32 %v1476_v36, %v764_v35 }
 0x1d4   : > { %v917_v39 = vpop.f32.mrf.mxu1  ;;  %v1038_v40 = vpop.f32.mrf.mxu0 }
 0x1d5   : > { %1078 = vst [vmem:[%s1877_s30 + $0x48] sm:$0xff] %v1062_v20  ;;  %v1067_v22 = vadd.f32 %v1494_v37, %v946_v21  ;;  %v944_v23 = vadd.f32 %v917_v39, %v756_v38 }
 0x1d6   : > { %v1477_v42 = vpop.f32.mrf.mxu1  ;;  %v1495_v43 = vpop.f32.mrf.mxu0 }
 0x1d7   : > { %1083 = vst [vmem:[%s1877_s30 + $0x70] sm:$0xff] %v1067_v22  ;;  %v1065_v24 = vadd.f32 %v1038_v40, %v944_v23  ;;  %v947_v25 = vadd.f32 %v1477_v42, %v767_v41 }
 0x1d8   : > { %v920_v45 = vpop.f32.mrf.mxu1  ;;  %v1041_v48 = vpop.f32.mrf.mxu0 }
 0x1d9   : > { %1081 = vst [vmem:[%s1877_s30 + $0x60] sm:$0xff] %v1065_v24  ;;  %v1068_v46 = vadd.f32 %v1495_v43, %v947_v25  ;;  %v945_v47 = vadd.f32 %v920_v45, %v759_v44 }
 0x1db   : > { %1084 = vst [vmem:[%s1877_s30 + $0x78] sm:$0xff] %v1068_v46  ;;  %v1066_v49 = vadd.f32 %v1041_v48, %v945_v47 }
 0x1dd   : > { %1082 = vst [vmem:[%s1877_s30 + $0x68] sm:$0xff] %v1066_v49 }
 0x1de PF: > { %s14_s15 = sadd.s32 1, %s1545_s15  }
 0x1df   : > { %p11_p4 = scmp.ge.s32.totalorder %s14_s15, 6  }
 0x1e1   :  { %13 = sbr.rel (!%p11_p4) target bundleno = 1 (0x1), region = 68 }

</bundles_post_ra>
